<compile_context>
chip_gen: v6e
topology: v6e:2x2x1
jax: 0.10.0
libtpu: 0.0.40
codegen_flags: <defaults>
</compile_context>

<pallas_src>
import jax
import jax.numpy as jnp
from jax import lax
from jax.experimental import pallas as pl
from jax.experimental.pallas import tpu as pltpu


def _discriminator_kernel(x_ref, w1_ref, b1_ref, w2_ref, b2_ref, out_ref):
    # x_ref:  (TB, Fin)   w1_ref: (H, Fin)   b1_ref: (1, H)
    # w2_ref: (1, H)      b2_ref: (1, 1) in SMEM      out_ref: (1, TB)
    x = x_ref[...]
    w1 = w1_ref[...]

    # Layer 1: x @ W1^T + b1  (MXU, f32 accumulation, trans_b contraction so no
    # wrapper-side transpose is needed).
    h = lax.dot_general(
        x, w1,
        dimension_numbers=(((1,), (1,)), ((), ())),
        preferred_element_type=jnp.float32,
    ) + b1_ref[...]
    # sigmoid(h) = 0.5 * tanh(0.5 * h) + 0.5   -> single EUP instruction
    h = 0.5 * jnp.tanh(0.5 * h) + 0.5                      # (TB, H)

    # Layer 2: (1, H) x (TB, H)^T -> (1, TB) lane-dense logits.
    logits = lax.dot_general(
        w2_ref[...], h,
        dimension_numbers=(((1,), (1,)), ((), ())),
        preferred_element_type=jnp.float32,
    ) + b2_ref[0, 0]
    out = 0.5 * jnp.tanh(0.5 * logits) + 0.5               # (1, TB)

    out_ref[...] = out.astype(out_ref.dtype)


def discriminator_forward(x, w1, b1, w2, b2, *, tb_max=256):
    """x: (B, Fin); w1: (H, Fin); b1: (H,); w2: (1, H); b2: (1,) -> (B,)"""
    B, Fin = x.shape
    H = w1.shape[0]

    # Batch tiling: single tile for small B, otherwise 256-row tiles (well
    # under v7x's 32 MiB default scoped VMEM even with double-buffering).
    if B <= tb_max:
        TB = B
        B_pad = B
    else:
        TB = tb_max
        B_pad = pl.cdiv(B, TB) * TB

    x_p = x if B_pad == B else jnp.pad(x, ((0, B_pad - B), (0, 0)))

    b1_row = b1.reshape(1, H)
    w2_row = w2.reshape(1, H)
    b2_s = b2.reshape(1, 1)

    num_tiles = B_pad // TB

    flops = 2 * B_pad * Fin * H + 2 * B_pad * H + 2 * B_pad
    transcendentals = B_pad * H + B_pad
    bytes_accessed = 4 * (B_pad * Fin + H * Fin + H + H + 1 + B_pad)

    out_row = pl.pallas_call(
        _discriminator_kernel,
        out_shape=jax.ShapeDtypeStruct((1, B_pad), x.dtype),
        grid=(num_tiles,),
        in_specs=[
            pl.BlockSpec((TB, Fin), lambda i: (i, 0)),     # x: batch-tiled
            pl.BlockSpec((H, Fin), lambda i: (0, 0)),      # W1: resident
            pl.BlockSpec((1, H), lambda i: (0, 0)),        # b1: resident
            pl.BlockSpec((1, H), lambda i: (0, 0)),        # W2: resident
            pl.BlockSpec(memory_space=pltpu.MemorySpace.SMEM),  # b2 scalar
        ],
        out_specs=pl.BlockSpec((1, TB), lambda i: (0, i)),  # lane-dense output
        compiler_params=pltpu.CompilerParams(
            dimension_semantics=("parallel",),
        ),
        cost_estimate=pl.CostEstimate(
            flops=flops,
            transcendentals=transcendentals,
            bytes_accessed=bytes_accessed,
        ),
    )(x_p, w1, b1_row, w2_row, b2_s)

    return out_row[0, :B]


def _reference(x, w1, b1, w2, b2):
    h = jax.nn.sigmoid(x @ w1.T + b1)
    return jax.nn.sigmoid(h @ w2.T + b2)[:, 0]


if __name__ == "__main__":
    # Small shapes consistent with the module: input (batch, input_size).
    B, Fin, H = 8, 16, 32

    key = jax.random.PRNGKey(0)
    kx, kw1, kb1, kw2, kb2 = jax.random.split(key, 5)

    x = jax.random.normal(kx, (B, Fin), dtype=jnp.float32)

    # PyTorch nn.Linear default init: U(-1/sqrt(fan_in), 1/sqrt(fan_in)).
    bound1 = 1.0 / (Fin ** 0.5)
    w1 = jax.random.uniform(kw1, (H, Fin), minval=-bound1, maxval=bound1,
                            dtype=jnp.float32)
    b1 = jax.random.uniform(kb1, (H,), minval=-bound1, maxval=bound1,
                            dtype=jnp.float32)
    bound2 = 1.0 / (H ** 0.5)
    w2 = jax.random.uniform(kw2, (1, H), minval=-bound2, maxval=bound2,
                            dtype=jnp.float32)
    b2 = jax.random.uniform(kb2, (1,), minval=-bound2, maxval=bound2,
                            dtype=jnp.float32)

    out = discriminator_forward(x, w1, b1, w2, b2)
    out = jax.block_until_ready(out)

    ref = _reference(x, w1, b1, w2, b2)
    assert out.shape == (B,), out.shape
    assert jnp.allclose(out, ref, atol=1e-4, rtol=1e-4), float(
        jnp.max(jnp.abs(out - ref))
    )

    # Also exercise the tiled / padded large-batch path (multi-step grid).
    B_big = 300
    x_big = jax.random.normal(jax.random.PRNGKey(1), (B_big, Fin),
                              dtype=jnp.float32)
    out_big = jax.block_until_ready(
        discriminator_forward(x_big, w1, b1, w2, b2))
    ref_big = _reference(x_big, w1, b1, w2, b2)
    assert out_big.shape == (B_big,), out_big.shape
    assert jnp.allclose(out_big, ref_big, atol=1e-4, rtol=1e-4), float(
        jnp.max(jnp.abs(out_big - ref_big))
    )

    print("KERNEL_OK")
</pallas_src>

<mosaic_0001>
module attributes {stable_mosaic.version = 11 : i64} {
  func.func @_discriminator_kernel(%arg0: i32, %arg1: memref<8x16xf32, #tpu.memory_space<vmem>>, %arg2: memref<32x16xf32, #tpu.memory_space<vmem>>, %arg3: memref<1x32xf32, #tpu.memory_space<vmem>>, %arg4: memref<1x32xf32, #tpu.memory_space<vmem>>, %arg5: memref<1x1xf32, #tpu.memory_space<smem>>, %arg6: memref<1x8xf32, #tpu.memory_space<vmem>>) attributes {dimension_semantics = [#tpu.dimension_semantics<parallel>], iteration_bounds = array<i64: 1>, scalar_prefetch = 0 : i64, scratch_operands = 0 : i64, tpu.core_type = #tpu.core_type<tc>, window_params = [{transform_indices = @transform_0, window_bounds = array<i64: 8, 16>}, {pipeline_mode = #tpu.pipeline_mode<synchronous>, transform_indices = @transform_1, window_bounds = array<i64: 32, 16>}, {pipeline_mode = #tpu.pipeline_mode<synchronous>, transform_indices = @transform_2, window_bounds = array<i64: 1, 32>}, {pipeline_mode = #tpu.pipeline_mode<synchronous>, transform_indices = @transform_3, window_bounds = array<i64: 1, 32>}, {transform_indices = @transform_4, window_bounds = array<i64: 1, 1>}, {transform_indices = @transform_5, window_bounds = array<i64: 1, 8>}]} {
    %c0 = arith.constant 0 : index
    %c0_0 = arith.constant 0 : index
    %0 = vector.load %arg1[%c0, %c0_0] : memref<8x16xf32, #tpu.memory_space<vmem>>, vector<8x16xf32>
    %c0_1 = arith.constant 0 : index
    %c0_2 = arith.constant 0 : index
    %1 = vector.load %arg2[%c0_1, %c0_2] : memref<32x16xf32, #tpu.memory_space<vmem>>, vector<32x16xf32>
    %cst = arith.constant dense<0.000000e+00> : vector<8x32xf32>
    %2 = tpu.matmul %0, %1, %cst {dimension_numbers = #tpu.dot_dimension_numbers<[1], [1], [0], [0], [0, 0, 1, 0], [], []>} : vector<8x16xf32>, vector<32x16xf32>, vector<8x32xf32> -> vector<8x32xf32>
    %c0_3 = arith.constant 0 : index
    %c0_4 = arith.constant 0 : index
    %3 = vector.load %arg3[%c0_3, %c0_4] : memref<1x32xf32, #tpu.memory_space<vmem>>, vector<1x32xf32>
    %4 = vector.broadcast %3 : vector<1x32xf32> to vector<8x32xf32>
    %5 = arith.addf %2, %4 : vector<8x32xf32>
    %cst_5 = arith.constant 5.000000e-01 : f32
    %6 = vector.broadcast %cst_5 : f32 to vector<8x32xf32>
    %7 = arith.mulf %6, %5 : vector<8x32xf32>
    %8 = math.tanh %7 : vector<8x32xf32>
    %cst_6 = arith.constant 5.000000e-01 : f32
    %9 = vector.broadcast %cst_6 : f32 to vector<8x32xf32>
    %10 = arith.mulf %9, %8 : vector<8x32xf32>
    %cst_7 = arith.constant 5.000000e-01 : f32
    %11 = vector.broadcast %cst_7 : f32 to vector<8x32xf32>
    %12 = arith.addf %10, %11 : vector<8x32xf32>
    %c0_8 = arith.constant 0 : index
    %c0_9 = arith.constant 0 : index
    %13 = vector.load %arg4[%c0_8, %c0_9] : memref<1x32xf32, #tpu.memory_space<vmem>>, vector<1x32xf32>
    %cst_10 = arith.constant dense<0.000000e+00> : vector<1x8xf32>
    %14 = tpu.matmul %13, %12, %cst_10 {dimension_numbers = #tpu.dot_dimension_numbers<[1], [1], [0], [0], [0, 0, 1, 0], [], []>} : vector<1x32xf32>, vector<8x32xf32>, vector<1x8xf32> -> vector<1x8xf32>
    %c0_11 = arith.constant 0 : index
    %c0_12 = arith.constant 0 : index
    %15 = memref.load %arg5[%c0_11, %c0_12] : memref<1x1xf32, #tpu.memory_space<smem>>
    %16 = vector.broadcast %15 : f32 to vector<1x8xf32>
    %17 = arith.addf %14, %16 : vector<1x8xf32>
    %cst_13 = arith.constant 5.000000e-01 : f32
    %18 = vector.broadcast %cst_13 : f32 to vector<1x8xf32>
    %19 = arith.mulf %18, %17 : vector<1x8xf32>
    %20 = math.tanh %19 : vector<1x8xf32>
    %cst_14 = arith.constant 5.000000e-01 : f32
    %21 = vector.broadcast %cst_14 : f32 to vector<1x8xf32>
    %22 = arith.mulf %21, %20 : vector<1x8xf32>
    %cst_15 = arith.constant 5.000000e-01 : f32
    %23 = vector.broadcast %cst_15 : f32 to vector<1x8xf32>
    %24 = arith.addf %22, %23 : vector<1x8xf32>
    %c0_16 = arith.constant 0 : index
    %c0_17 = arith.constant 0 : index
    %25 = vector.load %arg6[%c0_16, %c0_17] : memref<1x8xf32, #tpu.memory_space<vmem>>, vector<1x8xf32>
    tpu.vector_store %arg6[%c0_16, %c0_17], %24 {strides = array<i32>} : memref<1x8xf32, #tpu.memory_space<vmem>>, vector<1x8xf32>,
    return
  }
  func.func @transform_0(%arg0: i32) -> (i32, i32) {
    %c0_i32 = arith.constant 0 : i32
    %c0_i32_0 = arith.constant 0 : i32
    return %arg0, %c0_i32 : i32, i32
  }
  func.func @transform_1(%arg0: i32) -> (i32, i32) {
    %c0_i32 = arith.constant 0 : i32
    %c0_i32_0 = arith.constant 0 : i32
    %c0_i32_1 = arith.constant 0 : i32
    return %c0_i32, %c0_i32_0 : i32, i32
  }
  func.func @transform_2(%arg0: i32) -> (i32, i32) {
    %c0_i32 = arith.constant 0 : i32
    %c0_i32_0 = arith.constant 0 : i32
    %c0_i32_1 = arith.constant 0 : i32
    return %c0_i32, %c0_i32_0 : i32, i32
  }
  func.func @transform_3(%arg0: i32) -> (i32, i32) {
    %c0_i32 = arith.constant 0 : i32
    %c0_i32_0 = arith.constant 0 : i32
    %c0_i32_1 = arith.constant 0 : i32
    return %c0_i32, %c0_i32_0 : i32, i32
  }
  func.func @transform_4(%arg0: i32) -> (i32, i32) {
    %c0_i32 = arith.constant 0 : i32
    %c0_i32_0 = arith.constant 0 : i32
    %c0_i32_1 = arith.constant 0 : i32
    return %c0_i32, %c0_i32_0 : i32, i32
  }
  func.func @transform_5(%arg0: i32) -> (i32, i32) {
    %c0_i32 = arith.constant 0 : i32
    %c0_i32_0 = arith.constant 0 : i32
    return %c0_i32, %arg0 : i32, i32
  }
}

</mosaic_0001>

<bundles_post_ra>
// kernel: tpu_custom_call.1
= control target key start
LH: loop header
LB: loop body
LE: loop exit
PB: predicated region body
PF: predicated region fallthrough
CT: control target
= control target key end

     0   :  { %vm34_vm0 = vcmask 130048   ;;  %v284_v1 = vmov 0.0   ;;  %vm285_vm1 = vmmov 0   ;;  %s349_s0 = inlined_call_operand.vmem [shape: f32[8,16], index: 0, kind: input, shape index: {}]   ;;  %s350_s1 = inlined_call_operand.vmem [shape: f32[32,16], index: 1, kind: input, shape index: {}]   ;;  %s351_s2 = inlined_call_operand.vmem [shape: f32[1,32], index: 2, kind: input, shape index: {}]   ;;  %s352_s3 = inlined_call_operand.vmem [shape: f32[1,32], index: 3, kind: input, shape index: {}]   ;;  %s353_s4 = inlined_call_operand.<no memory space> [shape: f32[1,1], index: 4, kind: input, shape index: {}]   ;;  %s354_s5 = inlined_call_operand.hbm [shape: f32[1,8], index: 5, kind: output, shape index: {}]  }
   0x1   :  { %v26_v0 = vld [vmem:[%s350_s1 + $0x18] sm:$0xff]  ;;  %239 = vmatprep.subr.mxu0 %v284_v1  ;;  %247 = vmatprep.mubr.msk.f32.mxu0 %vm285_vm1, %v284_v1 }
   0x2   :  { %240 = vmatpush3.xpose.msk.msra.mxu0 %vm34_vm0, %v26_v0  ;;  %250 = vmatprep.subr.mxu1 %v284_v1 }
   0x3   :  { %11 = vsyncpa [#allocation4], 0  ;;  %241 = vmatprep.subr.mxu0 %v284_v1  ;;  %v25_v2 = vld [vmem:[%s350_s1 + $0x10] sm:$0xff]  ;;  %252 = vmatprep.mubr.msk.f32.mxu1 %vm285_vm1, %v284_v1  ;;  %v24_v3 = vld [vmem:[%s350_s1 + $0x8] sm:$0xff]  ;;  %vm127_vm2 = vcmask 261120   ;;  %v126_v15 = vstv %s353_s4  ;;  %vm208_vm3 = vcmask 57344  }
   0x4   :  { %v23_v4 = vld [vmem:[%s350_s1] sm:$0xff] }
   0x5   :  { %v22_v5 = vld [vmem:[%s349_s0] sm:$0xff] }
   0x6   :  { %242 = vmatpush3.xpose.msk.msra.mxu0 %vm34_vm0, %v25_v2  ;;  %v224_v6 = vld [vmem:[%s351_s2] ss:$0 sm:$0xff]  ;;  %s286_s2 = smov [#allocation3]  }
   0x7   :  { %243 = vmatprep.subr.mxu0 %v284_v1  ;;  %v124_v14 = vld [vmem:[%s352_s3] sm:$0x1]  ;;  %s216_s7 = sshll.u32 %s286_s2, 4  ;;  %s217_s7 = int_to_ptr.vmem [resolvable:$true] %s216_s7 }
   0x8   :  { %s262_s8 = scalar_lea.vmem %s217_s7, 16  ;;  %s266_s3 = scalar_lea.vmem %s217_s7, 32 }
   0x9   :  { %p263_p0 = scmp.ne.s32.totalorder %s217_s7, %s262_s8  ;;  %p267_p1 = scmp.lt.s32.totalorder %s217_s7, %s217_s7 }
   0xa   :  { %244 = vmatpush3.xpose.msk.msra.mxu0 %vm34_vm0, %v24_v3  ;;  %p268_p2 = scmp.lt.s32.totalorder %s266_s3, %s262_s8 }
   0xb   :  { %245 = vmatprep.subr.mxu0 %v284_v1 }
   0xc   :  { %p269_p3 = por %p268_p2, %p267_p1 }
   0xe   :  { %246 = vmatpush3.xpose.msk.msra.mxu0 %vm34_vm0, %v23_v4  ;;  %p270_p4 = pnand %p269_p3, %p263_p0 }
  0x11   :  { %248 = vmatmul.mubr.msk.f32.vlgmr.msra.gmra.mxu0 %vm34_vm0, %v22_v5 }
  0xd1   :  { %v116_v7 = vpop.f32.mrf.mxu0 }
  0xd2   :  { %v117_v8 = vadd.f32 %v224_v6, %v116_v7 }
  0xd3   :  { %v249_v9 = vpop.f32.mrf.mxu0 }
  0xd4   :  { %v120_v10 = vmul.f32 0.5, %v117_v8 }
  0xd6   :  { %258 = vtanh.f32 %v120_v10 }
  0xe3   :  { %v259_v11 = vpop.eup %258 }
  0xe4   :  { %v122_v12 = vmul.f32 0.5, %v259_v11 }
  0xe6   :  { %v123_v13 = vadd.f32 0.5, %v122_v12 }
  0xe8   :  { %251 = vmatpush3.xpose.msk.msra.mxu1 %vm127_vm2, %v123_v13 }
  0xeb   :  { %253 = vmatmul.mubr.msk.f32.vlgmr.msra.gmra.mxu1 %vm127_vm2, %v124_v14 }
 0x1ab   :  { %v200_v16 = vpop.f32.mrf.mxu1 }
 0x1ac   :  { %v201_v17 = vadd.f32 %v200_v16, %v126_v15 }
 0x1ad   :  { %v254_v18 = vpop.f32.mrf.mxu1 }
 0x1ae   :  { %v204_v19 = vmul.f32 0.5, %v201_v17 }
 0x1b0   :  { %260 = vtanh.f32 %v204_v19 }
 0x1bd   :  { %v261_v20 = vpop.eup %260 }
 0x1be   :  { %v206_v21 = vmul.f32 0.5, %v261_v20 }
 0x1c0   :  { %v207_v22 = vadd.f32 0.5, %v206_v21 }
 0x1c2   :  { %209 = vst.msk [vmem:[#allocation3] sm:$0x1] %vm208_vm3, %v207_v22 }
 0x1c3   :  { %273 = shalt.err (!%p270_p4)
}
 0x1c4   :  { %219 = dma.vmem_to_hbm [thread:$0]  %s217_s7, 16, %s354_s5, [#allocation4]  }
 0x1c5   :  { %282 = dma.done.wait [#allocation4], 16  }
 0x1c6   :  { %283 = vsyncadd [#allocation4], 4294967280 }
 0x1c7   :  { %223 = vsyncpa [#allocation4], 1 }

</bundles_post_ra>
